<compile_context>
chip_gen: v5e
topology: v5e:2x2
jax: 0.10.0
libtpu: 0.0.40
codegen_flags: <defaults>
</compile_context>

<pallas_src>
import functools

import jax
import jax.numpy as jnp
from jax import lax
from jax.experimental import pallas as pl
from jax.experimental.pallas import tpu as pltpu


def _round_up(x, m):
    return ((x + m - 1) // m) * m


def _pos_embedding_kernel(idx_ref, emb_ref, fcw_ref, out_ref, x_scratch, *, v_valid):
    """One batch tile: gather -> fc matmul -> masked log-softmax.

    idx_ref  : SMEM (B_pad,) int32   — scalar-prefetched POS-tag indices
    emb_ref  : VMEM (V, E) f32       — embedding table (resident across grid)
    fcw_ref  : VMEM (V_pad, E) f32   — fc weight, vocab-padded, nn.Linear layout
    out_ref  : VMEM (TB, V_pad) f32  — lane-dense log-softmax output tile
    x_scratch: VMEM (TB, E)  f32     — gathered embedding rows
    """
    tb, v_pad = out_ref.shape
    b = pl.program_id(0)

    # Direct row gather from the VMEM-resident table, indices read from SMEM.
    def gather_row(r, carry):
        row = idx_ref[b * tb + r]
        x_scratch[pl.ds(r, 1), :] = emb_ref[pl.ds(row, 1), :]
        return carry

    lax.fori_loop(0, tb, gather_row, None)

    # Dropout(0.5): eval-mode identity.
    # TODO(synk): training-mode dropout mask via pltpu.prng_seed / prng_random_bits.

    # fc (no bias): contract on E without materializing fc_w.T
    logits = lax.dot_general(
        x_scratch[...],
        fcw_ref[...],
        dimension_numbers=(((1,), (1,)), ((), ())),
        preferred_element_type=jnp.float32,
    )  # (TB, V_pad)

    # Padded vocab lanes must not contribute to the softmax normalizer.
    lane = lax.broadcasted_iota(jnp.int32, (tb, v_pad), 1)
    logits = jnp.where(lane < v_valid, logits, -jnp.inf)

    # Numerically-stable log_softmax over the vocab axis.
    m = jnp.max(logits, axis=-1, keepdims=True)
    shifted = logits - m
    lse = jnp.log(jnp.sum(jnp.exp(shifted), axis=-1, keepdims=True))
    out_ref[...] = shifted - lse


def pos_embedding_forward(idx, emb_w, fc_w, *, block_b=128):
    """idx: (B,) int indices; emb_w: (V, E) f32; fc_w: (V, E) f32 (nn.Linear layout)."""
    B = idx.shape[0]
    V, E = emb_w.shape

    V_pad = _round_up(V, 128)                               # lane-dense output
    TB = min(_round_up(block_b, 8), _round_up(B, 8))        # batch tile (multiple of 8)
    B_pad = _round_up(B, TB)
    grid_b = B_pad // TB

    idx_p = jnp.zeros((B_pad,), jnp.int32).at[:B].set(idx.astype(jnp.int32))
    fcw_p = jnp.zeros((V_pad, E), fc_w.dtype).at[:V, :].set(fc_w)   # pad vocab rows, no transpose

    kernel = functools.partial(_pos_embedding_kernel, v_valid=V)

    out_p = pl.pallas_call(
        kernel,
        out_shape=jax.ShapeDtypeStruct((B_pad, V_pad), jnp.float32),
        grid_spec=pltpu.PrefetchScalarGridSpec(
            num_scalar_prefetch=1,                          # idx -> SMEM
            grid=(grid_b,),
            in_specs=[
                pl.BlockSpec((V, E), lambda i, idx_ref: (0, 0)),      # embedding table
                pl.BlockSpec((V_pad, E), lambda i, idx_ref: (0, 0)),  # fc weight (padded)
            ],
            out_specs=pl.BlockSpec((TB, V_pad), lambda i, idx_ref: (i, 0)),
            scratch_shapes=[pltpu.VMEM((TB, E), jnp.float32)],
        ),
        compiler_params=pltpu.CompilerParams(
            dimension_semantics=("parallel",),              # batch tiles shard across TCs (v7x)
        ),
    )(idx_p, emb_w, fcw_p)

    return out_p[:B, :V]


if __name__ == "__main__":
    # POS-tag-sized vocab, small embedding, a batch of tag indices.
    V, E, B = 48, 32, 256

    key = jax.random.PRNGKey(0)
    k_emb, k_fc, k_idx = jax.random.split(key, 3)

    # Xavier-uniform init for the embedding (as in the module __init__).
    limit = (6.0 / (V + E)) ** 0.5
    emb_w = jax.random.uniform(k_emb, (V, E), jnp.float32, -limit, limit)

    # PyTorch default-style uniform init for the fc weight (nn.Linear, no bias).
    fc_limit = (1.0 / E) ** 0.5
    fc_w = jax.random.uniform(k_fc, (V, E), jnp.float32, -fc_limit, fc_limit)

    # Input: batch of POS-tag indices.
    idx = jax.random.randint(k_idx, (B,), 0, V, dtype=jnp.int32)

    out = pos_embedding_forward(idx, emb_w, fc_w, block_b=128)
    out = jax.block_until_ready(out)

    # Pure-JAX reference (embedding -> fc -> log_softmax; dropout is eval-identity).
    ref = jax.nn.log_softmax(emb_w[idx] @ fc_w.T, axis=1)
    assert out.shape == (B, V)
    assert jnp.allclose(out, ref, atol=1e-4), "mismatch vs reference"

    print("KERNEL_OK")
</pallas_src>

<mosaic_0001>
module attributes {stable_mosaic.version = 11 : i64} {
  func.func @_pos_embedding_kernel(%arg0: i32, %arg1: memref<256xi32, #tpu.memory_space<smem>>, %arg2: memref<48x32xf32, #tpu.memory_space<vmem>>, %arg3: memref<128x32xf32, #tpu.memory_space<vmem>>, %arg4: memref<128x128xf32, #tpu.memory_space<vmem>>, %arg5: memref<128x32xf32, #tpu.memory_space<vmem>>) attributes {dimension_semantics = [#tpu.dimension_semantics<parallel>], iteration_bounds = array<i64: 2>, scalar_prefetch = 1 : i64, scratch_operands = 1 : i64, tpu.core_type = #tpu.core_type<tc>, window_params = [{pipeline_mode = #tpu.pipeline_mode<synchronous>, transform_indices = @transform_0, window_bounds = array<i64: 48, 32>}, {pipeline_mode = #tpu.pipeline_mode<synchronous>, transform_indices = @transform_1, window_bounds = array<i64: 128, 32>}, {transform_indices = @transform_2, window_bounds = array<i64: 128, 128>}]} {
    %c0_i32 = arith.constant 0 : i32
    %c128_i32 = arith.constant 128 : i32
    %0 = arith.addi %c0_i32, %c128_i32 : i32
    %c1_i32 = arith.constant 1 : i32
    scf.for %arg6 = %c0_i32 to %0 step %c1_i32  : i32 {
      %c128_i32_9 = arith.constant 128 : i32
      %20 = arith.muli %arg0, %c128_i32_9 : i32
      %21 = arith.addi %20, %arg6 : i32
      %22 = arith.index_cast %21 : i32 to index
      %23 = memref.load %arg1[%22] : memref<256xi32, #tpu.memory_space<smem>>
      %24 = arith.index_cast %23 : i32 to index
      %c0_10 = arith.constant 0 : index
      %25 = vector.load %arg2[%24, %c0_10] : memref<48x32xf32, #tpu.memory_space<vmem>>, vector<1x32xf32>
      %26 = arith.index_cast %arg6 : i32 to index
      %c0_11 = arith.constant 0 : index
      %27 = vector.load %arg5[%26, %c0_11] : memref<128x32xf32, #tpu.memory_space<vmem>>, vector<1x32xf32>
      tpu.vector_store %arg5[%26, %c0_11], %25 {strides = array<i32>} : memref<128x32xf32, #tpu.memory_space<vmem>>, vector<1x32xf32>,
    }
    %c128_i32_0 = arith.constant 128 : i32
    %c0 = arith.constant 0 : index
    %c0_1 = arith.constant 0 : index
    %1 = vector.load %arg5[%c0, %c0_1] : memref<128x32xf32, #tpu.memory_space<vmem>>, vector<128x32xf32>
    %c0_2 = arith.constant 0 : index
    %c0_3 = arith.constant 0 : index
    %2 = vector.load %arg3[%c0_2, %c0_3] : memref<128x32xf32, #tpu.memory_space<vmem>>, vector<128x32xf32>
    %cst = arith.constant dense<0.000000e+00> : vector<128x128xf32>
    %3 = tpu.matmul %1, %2, %cst {dimension_numbers = #tpu.dot_dimension_numbers<[1], [1], [0], [0], [0, 0, 1, 0], [], []>} : vector<128x32xf32>, vector<128x32xf32>, vector<128x128xf32> -> vector<128x128xf32>
    %4 = tpu.iota {dimensions = array<i32: 1>} : vector<128x128xi32>
    %c48_i32 = arith.constant 48 : i32
    %5 = vector.broadcast %c48_i32 : i32 to vector<128x128xi32>
    %6 = arith.cmpi slt, %4, %5 : vector<128x128xi32>
    %cst_4 = arith.constant 0xFF800000 : f32
    %7 = vector.broadcast %cst_4 : f32 to vector<128x128xf32>
    %8 = arith.select %6, %3, %7 : vector<128x128xi1>, vector<128x128xf32>
    %cst_5 = arith.constant dense<0xFF800000> : vector<128xf32>
    %9 = vector.multi_reduction <maximumf>, %8, %cst_5 [1] : vector<128x128xf32> to vector<128xf32>
    %10 = vector.shape_cast %9 : vector<128xf32> to vector<128x1xf32>
    %11 = vector.broadcast %10 : vector<128x1xf32> to vector<128x128xf32>
    %12 = arith.subf %8, %11 : vector<128x128xf32>
    %13 = math.exp %12 : vector<128x128xf32>
    %cst_6 = arith.constant dense<0.000000e+00> : vector<128xf32>
    %14 = vector.multi_reduction <add>, %13, %cst_6 [1] : vector<128x128xf32> to vector<128xf32>
    %15 = vector.shape_cast %14 : vector<128xf32> to vector<128x1xf32>
    %16 = math.log %15 : vector<128x1xf32>
    %17 = vector.broadcast %16 : vector<128x1xf32> to vector<128x128xf32>
    %18 = arith.subf %12, %17 : vector<128x128xf32>
    %c0_7 = arith.constant 0 : index
    %c0_8 = arith.constant 0 : index
    %19 = vector.load %arg4[%c0_7, %c0_8] : memref<128x128xf32, #tpu.memory_space<vmem>>, vector<128x128xf32>
    tpu.vector_store %arg4[%c0_7, %c0_8], %18 {strides = array<i32>} : memref<128x128xf32, #tpu.memory_space<vmem>>, vector<128x128xf32>,
    return
  }
  func.func @transform_0(%arg0: i32, %arg1: memref<256xi32, #tpu.memory_space<smem>>) -> (i32, i32) {
    %c0_i32 = arith.constant 0 : i32
    %c0_i32_0 = arith.constant 0 : i32
    %c0_i32_1 = arith.constant 0 : i32
    return %c0_i32, %c0_i32_0 : i32, i32
  }
  func.func @transform_1(%arg0: i32, %arg1: memref<256xi32, #tpu.memory_space<smem>>) -> (i32, i32) {
    %c0_i32 = arith.constant 0 : i32
    %c0_i32_0 = arith.constant 0 : i32
    %c0_i32_1 = arith.constant 0 : i32
    return %c0_i32, %c0_i32_0 : i32, i32
  }
  func.func @transform_2(%arg0: i32, %arg1: memref<256xi32, #tpu.memory_space<smem>>) -> (i32, i32) {
    %c0_i32 = arith.constant 0 : i32
    %c0_i32_0 = arith.constant 0 : i32
    return %arg0, %c0_i32 : i32, i32
  }
}

</mosaic_0001>

<bundles_post_ra>
// kernel: tpu_custom_call.1
= control target key start
LH: loop header
LB: loop body
LE: loop exit
PB: predicated region body
PF: predicated region fallthrough
CT: control target
= control target key end

     0   :  { %s899_s15 = smov [#allocation4]   ;;  %s1274_s0 = inlined_call_operand.vmem [shape: s32[256], index: 0, kind: input, shape index: {}]   ;;  %s1275_s1 = inlined_call_operand.vmem [shape: f32[48,32], index: 1, kind: input, shape index: {}]   ;;  %s1276_s2 = inlined_call_operand.vmem [shape: f32[128,32], index: 2, kind: input, shape index: {}]   ;;  %s1277_s3 = inlined_call_operand.hbm [shape: f32[256,128], index: 3, kind: output, shape index: {}]  }
   0x1   :  { %s9_s14 = sshll.u32 %s1274_s0, 4  ;;  %s10_s14 = int_to_ptr.vmem [resolvable:$true] %s9_s14 }
   0x2   :  { %12 = dma.vmem_to_smem %s10_s14, 32, %s899_s15, [#allocation3] }
   0x3   :  { %873 = dma.done.wait [#allocation3], 32 }
   0x4   :  { %874 = vsyncadd [#allocation3], 4294967264 }
   0x5   :  { %15 = sfence }
   0x6   :  { %16 = vsyncpa [#allocation6], 0 }
   0x7   :  { %18 = vsyncpa [#allocation6 + $0x1], 0  ;;  %s925_s16 = smov 0   ;;  %s927_s17 = smov 0  }
   0x8   :  { %s929_s18 = smov 0   ;;  %s931_s19 = smov 0  }
   0x9 LB: > { %s607_s0 = sadd.s32 4294967295, %s893_s19   ;;  %s608_s20 = sadd.s32 4294967294, %s893_s19   ;;  %s893_s19 = sphi %s931_s19, %s1283_s19   ;;  %s889_s18 = sphi %s929_s18, %s1282_s18   ;;  %s885_s17 = sphi %s927_s17, %s1281_s17   ;;  %s881_s16 = sphi %s925_s16, %s1280_s16  }
   0xa   : > { %s948_s21 = sadd.s32 1, %s893_s19   ;;  %s73_s22 = sadd.s32 1, %s889_s18 }
   0xb   : > { %s70_s23 = ssub.s32 %s893_s19, %s948_s21  ;;  %p83_p0 = scmp.ne.s32.totalorder %s889_s18, %s885_s17 }
   0xc   : > { %p71_p1 = scmp.eq.s32.totalorder %s70_s23, 0  ;;  %p84_p2 = scmp.eq.s32.totalorder %s607_s0, 1 }
   0xd   : > { %p89_p3 = scmp.ne.s32.totalorder %s885_s17, %s881_s16  ;;  %p90_p4 = scmp.eq.s32.totalorder %s608_s20, 1 }
   0xe   : > { %s960_s24 = scalar_select %p71_p1, %s889_s18, %s73_s22  }
   0xf   : > { %p962_p5 = por %p84_p2, %p83_p0  ;;  %p966_p6 = por %p90_p4, %p89_p3 }
  0x10   : > { %p610_p7 = scmp.ge.s32.totalorder %s893_s19, 1  ;;  %p114_p8 = scmp.lt.s32.totalorder %s893_s19, 3 }
  0x12   : > { %p115_p9 = pnand %p610_p7, %p114_p8 }
  0x13   : > { %s128_s27 = sand.u32 (!%p115_p9), 1, %s885_s17   ;;  %s895_s30 = smov (!%p115_p9), 0  }
  0x14   : > { %118 = sbr.rel (%p115_p9) target bundleno = 527 (0x20f), region = 28  ;;  %s611_s28 = sshll.u32 (!%p115_p9), %s128_s27, 7 }
  0x15   : > { %s975_s29 = scalar_lea.vmem (!%p115_p9), [#allocation5], %s611_s28 }
  0x19 LB: >> { %s979_s4 = sshll.u32 %s607_s0, 7  ;;  %vm144_vm0 = vcmask 253952   ;;  %s143_s10 = scalar_lea.vmem [#allocation2], %s897_s30  ;;  %s897_s30 = sphi %s895_s30, %s137_s30  }
  0x1a   : >> { %s139_s5 = sadd.s32 %s897_s30, %s979_s4  ;;  %s137_s30 = sadd.s32 1, %s897_s30  }
  0x1b   : >> { %s140_s6 = sld [smem:[#allocation4 + %s139_s5]]  ;;  %p134_p10 = scmp.ge.s32.totalorder %s137_s30, 128  }
  0x1c   : > { %v177_v1 = vld [vmem:[%s1276_s2 + $0x78] sm:$0xff] (%p134_p10)  ;;  %vm178_vm1 = vcmask (%p134_p10), 261120   ;;  %v176_v2 = vld [vmem:[%s1276_s2 + $0x70] sm:$0xff] (%p134_p10)  ;;  %v175_v3 = vld [vmem:[%s1276_s2 + $0x68] sm:$0xff] (%p134_p10)  ;;  %v340_v33 = vlaneseq (%p134_p10)  ;;  %s547_s11 = scalar_lea.hbm (%p134_p10), %s1277_s3, %s979_s4  ;;  %s548_s12 = sshll.u32 (%p134_p10), %s975_s29, 4  ;;  %s549_s12 = int_to_ptr.vmem [resolvable:$true] %s548_s12 }
  0x1d   : > { %613 = vmatpush.xpose.msk.msra.mxu0 (%p134_p10), %vm178_vm1, %v177_v1  ;;  %651 = vmatpush.xpose.msk.msra.mxu1 (%p134_p10), %vm178_vm1, %v177_v1  ;;  %v174_v4 = vld [vmem:[%s1276_s2 + $0x60] sm:$0xff] (%p134_p10)  ;;  %v173_v5 = vld [vmem:[%s1276_s2 + $0x58] sm:$0xff] (%p134_p10)  ;;  %v172_v6 = vld [vmem:[%s1276_s2 + $0x50] sm:$0xff] (%p134_p10)  ;;  %s1238_s13 = sshll.u32 (%p134_p10), %s547_s11, 4  ;;  %s536_s4 = scalar_lea.sflag (%p134_p10), [#allocation6], %s128_s27  ;;  %s551_s13 = int_to_ptr.hbm [resolvable:$true] %s1238_s13 }
  0x1e   : > { %652 = vmatpush.xpose.msk.msra.mxu2 (%p134_p10), %vm178_vm1, %v177_v1  ;;  %653 = vmatpush.xpose.msk.msra.mxu3 (%p134_p10), %vm178_vm1, %v177_v1  ;;  %v171_v7 = vld [vmem:[%s1276_s2 + $0x48] sm:$0xff] (%p134_p10)  ;;  %v170_v8 = vld [vmem:[%s1276_s2 + $0x40] sm:$0xff] (%p134_p10)  ;;  %v169_v9 = vld [vmem:[%s1276_s2 + $0x38] sm:$0xff] (%p134_p10)  ;;  %v341_v34 = vand.u32 (%p134_p10), 127, %v340_v33  ;;  %s839_s14 = sshra.s32 (%p134_p10), %s551_s13, 4  ;;  %s845_s22 = scalar_lea.hbm (%p134_p10), %s1277_s3, 256  ;;  %s840_s14 = int_to_ptr.hbm [resolvable:$true] %s839_s14 }
  0x1f   : > { %136 = sbr.rel (!%p134_p10) target bundleno = 25 (0x19), region = 69  ;;  %v168_v10 = vld [vmem:[%s1276_s2 + $0x30] sm:$0xff] (%p134_p10)  ;;  %v167_v11 = vld [vmem:[%s1276_s2 + $0x28] sm:$0xff] (%p134_p10)  ;;  %v166_v12 = vld [vmem:[%s1276_s2 + $0x20] sm:$0xff] (%p134_p10)  ;;  %s841_s15 = scalar_lea.hbm (%p134_p10), %s840_s14, 128 }
  0x20   : > { %v165_v13 = vld [vmem:[%s1276_s2 + $0x18] sm:$0xff] (%p134_p10)  ;;  %v164_v14 = vld [vmem:[%s1276_s2 + $0x10] sm:$0xff] (%p134_p10)  ;;  %v163_v15 = vld [vmem:[%s1276_s2 + $0x8] sm:$0xff] (%p134_p10)  ;;  %vm342_vm2 = vcmp.lt.s32.totalorder (%p134_p10), %v341_v34, 48  ;;  %p842_p11 = scmp.ne.s32.totalorder (%p134_p10), %s840_s14, %s841_s15  ;;  %p846_p0 = scmp.lt.s32.totalorder (%p134_p10), %s840_s14, %s1277_s3 }
  0x21   : >> { %s141_s9 = scalar_lea.vmem %s1275_s1, %s140_s6  ;;  %614 = vmatpush.xpose.msk.msra.mxu0 (%p134_p10), %vm178_vm1, %v176_v2  ;;  %654 = vmatpush.xpose.msk.msra.mxu1 (%p134_p10), %vm178_vm1, %v176_v2  ;;  %v162_v16 = vld [vmem:[%s1276_s2] sm:$0xff] (%p134_p10)  ;;  %p847_p1 = scmp.lt.s32.totalorder (%p134_p10), %s845_s22, %s841_s15 }
  0x22   : >> { %v142_v0 = vld [vmem:[%s141_s9] sm:$0x1]  ;;  %655 = vmatpush.xpose.msk.msra.mxu2 (%p134_p10), %vm178_vm1, %v176_v2  ;;  %656 = vmatpush.xpose.msk.msra.mxu3 (%p134_p10), %vm178_vm1, %v176_v2  ;;  %p843_p12 = pnand (%p134_p10), %p842_p11, %p962_p5 }
  0x23   : >> { %145 = vst.msk [vmem:[%s143_s10] sm:$0x1] %vm144_vm0, %v142_v0  ;;  %p848_p2 = por (%p134_p10), %p847_p1, %p846_p0 }
  0x24   : > { %p844_p13 = pneg %p843_p12 }
  0x25   : > { %615 = vmatpush.xpose.msk.msra.mxu0 %vm178_vm1, %v175_v3  ;;  %657 = vmatpush.xpose.msk.msra.mxu1 %vm178_vm1, %v175_v3 }
  0x26   : > { %658 = vmatpush.xpose.msk.msra.mxu2 %vm178_vm1, %v175_v3  ;;  %659 = vmatpush.xpose.msk.msra.mxu3 %vm178_vm1, %v175_v3  ;;  %p849_p3 = pnand %p848_p2, %p844_p13 }
  0x29   : > { %616 = vmatpush.xpose.msk.msra.mxu0 %vm178_vm1, %v174_v4  ;;  %660 = vmatpush.xpose.msk.msra.mxu1 %vm178_vm1, %v174_v4 }
  0x2a   : > { %661 = vmatpush.xpose.msk.msra.mxu2 %vm178_vm1, %v174_v4  ;;  %662 = vmatpush.xpose.msk.msra.mxu3 %vm178_vm1, %v174_v4  ;;  %v146_v17 = vld [vmem:[#allocation2] sm:$0xff]  ;;  %v147_v21 = vld [vmem:[#allocation2 + $0x8] sm:$0xff]  ;;  %v148_v25 = vld [vmem:[#allocation2 + $0x10] sm:$0xff] }
  0x2b   : > { %v150_v18 = vld [vmem:[#allocation2 + $0x20] sm:$0xff]  ;;  %v151_v22 = vld [vmem:[#allocation2 + $0x28] sm:$0xff]  ;;  %v152_v26 = vld [vmem:[#allocation2 + $0x30] sm:$0xff] }
  0x2c   : > { %v154_v19 = vld [vmem:[#allocation2 + $0x40] sm:$0xff]  ;;  %v155_v23 = vld [vmem:[#allocation2 + $0x48] sm:$0xff]  ;;  %v156_v27 = vld [vmem:[#allocation2 + $0x50] sm:$0xff] }
  0x2d   : > { %617 = vmatpush.xpose.msk.msra.mxu0 %vm178_vm1, %v173_v5  ;;  %663 = vmatpush.xpose.msk.msra.mxu1 %vm178_vm1, %v173_v5  ;;  %v158_v20 = vld [vmem:[#allocation2 + $0x60] sm:$0xff]  ;;  %v159_v24 = vld [vmem:[#allocation2 + $0x68] sm:$0xff]  ;;  %v160_v28 = vld [vmem:[#allocation2 + $0x70] sm:$0xff] }
  0x2e   : > { %664 = vmatpush.xpose.msk.msra.mxu2 %vm178_vm1, %v173_v5  ;;  %665 = vmatpush.xpose.msk.msra.mxu3 %vm178_vm1, %v173_v5  ;;  %v149_v29 = vld [vmem:[#allocation2 + $0x18] sm:$0xff] }
  0x2f   : > { %v153_v30 = vld [vmem:[#allocation2 + $0x38] sm:$0xff] }
  0x30   : > { %v157_v31 = vld [vmem:[#allocation2 + $0x58] sm:$0xff] }
  0x31   : > { %618 = vmatpush.xpose.msk.msra.mxu0 %vm178_vm1, %v172_v6  ;;  %666 = vmatpush.xpose.msk.msra.mxu1 %vm178_vm1, %v172_v6  ;;  %v161_v32 = vld [vmem:[#allocation2 + $0x78] sm:$0xff] }
  0x32   : > { %667 = vmatpush.xpose.msk.msra.mxu2 %vm178_vm1, %v172_v6  ;;  %668 = vmatpush.xpose.msk.msra.mxu3 %vm178_vm1, %v172_v6 }
  0x35   : > { %619 = vmatpush.xpose.msk.msra.mxu0 %vm178_vm1, %v171_v7  ;;  %669 = vmatpush.xpose.msk.msra.mxu1 %vm178_vm1, %v171_v7 }
  0x36   : > { %670 = vmatpush.xpose.msk.msra.mxu2 %vm178_vm1, %v171_v7  ;;  %671 = vmatpush.xpose.msk.msra.mxu3 %vm178_vm1, %v171_v7 }
  0x39   : > { %620 = vmatpush.xpose.msk.msra.mxu0 %vm178_vm1, %v170_v8  ;;  %672 = vmatpush.xpose.msk.msra.mxu1 %vm178_vm1, %v170_v8 }
  0x3a   : > { %673 = vmatpush.xpose.msk.msra.mxu2 %vm178_vm1, %v170_v8  ;;  %674 = vmatpush.xpose.msk.msra.mxu3 %vm178_vm1, %v170_v8 }
  0x3d   : > { %621 = vmatpush.xpose.msk.msra.mxu0 %vm178_vm1, %v169_v9  ;;  %675 = vmatpush.xpose.msk.msra.mxu1 %vm178_vm1, %v169_v9 }
  0x3e   : > { %676 = vmatpush.xpose.msk.msra.mxu2 %vm178_vm1, %v169_v9  ;;  %677 = vmatpush.xpose.msk.msra.mxu3 %vm178_vm1, %v169_v9 }
  0x41   : > { %622 = vmatpush.xpose.msk.msra.mxu0 %vm178_vm1, %v168_v10  ;;  %678 = vmatpush.xpose.msk.msra.mxu1 %vm178_vm1, %v168_v10 }
  0x42   : > { %679 = vmatpush.xpose.msk.msra.mxu2 %vm178_vm1, %v168_v10  ;;  %680 = vmatpush.xpose.msk.msra.mxu3 %vm178_vm1, %v168_v10 }
  0x45   : > { %623 = vmatpush.xpose.msk.msra.mxu0 %vm178_vm1, %v167_v11  ;;  %681 = vmatpush.xpose.msk.msra.mxu1 %vm178_vm1, %v167_v11 }
  0x46   : > { %682 = vmatpush.xpose.msk.msra.mxu2 %vm178_vm1, %v167_v11  ;;  %683 = vmatpush.xpose.msk.msra.mxu3 %vm178_vm1, %v167_v11 }
  0x49   : > { %624 = vmatpush.xpose.msk.msra.mxu0 %vm178_vm1, %v166_v12  ;;  %684 = vmatpush.xpose.msk.msra.mxu1 %vm178_vm1, %v166_v12 }
  0x4a   : > { %685 = vmatpush.xpose.msk.msra.mxu2 %vm178_vm1, %v166_v12  ;;  %686 = vmatpush.xpose.msk.msra.mxu3 %vm178_vm1, %v166_v12 }
  0x4d   : > { %625 = vmatpush.xpose.msk.msra.mxu0 %vm178_vm1, %v165_v13  ;;  %687 = vmatpush.xpose.msk.msra.mxu1 %vm178_vm1, %v165_v13 }
  0x4e   : > { %688 = vmatpush.xpose.msk.msra.mxu2 %vm178_vm1, %v165_v13  ;;  %689 = vmatpush.xpose.msk.msra.mxu3 %vm178_vm1, %v165_v13 }
  0x51   : > { %626 = vmatpush.xpose.msk.msra.mxu0 %vm178_vm1, %v164_v14  ;;  %690 = vmatpush.xpose.msk.msra.mxu1 %vm178_vm1, %v164_v14 }
  0x52   : > { %691 = vmatpush.xpose.msk.msra.mxu2 %vm178_vm1, %v164_v14  ;;  %692 = vmatpush.xpose.msk.msra.mxu3 %vm178_vm1, %v164_v14 }
  0x55   : > { %627 = vmatpush.xpose.msk.msra.mxu0 %vm178_vm1, %v163_v15  ;;  %693 = vmatpush.xpose.msk.msra.mxu1 %vm178_vm1, %v163_v15 }
  0x56   : > { %694 = vmatpush.xpose.msk.msra.mxu2 %vm178_vm1, %v163_v15  ;;  %695 = vmatpush.xpose.msk.msra.mxu3 %vm178_vm1, %v163_v15 }
  0x59   : > { %628 = vmatpush.xpose.msk.msra.mxu0 %vm178_vm1, %v162_v16  ;;  %696 = vmatpush.xpose.msk.msra.mxu1 %vm178_vm1, %v162_v16 }
  0x5a   : > { %697 = vmatpush.xpose.msk.msra.mxu2 %vm178_vm1, %v162_v16  ;;  %698 = vmatpush.xpose.msk.msra.mxu3 %vm178_vm1, %v162_v16 }
  0x5c   : > { %629 = vmatmul.msk.f32.vlgmr.msra.gmra.mxu0 %vm178_vm1, %v146_v17  ;;  %633 = vmatmul.msk.f32.vlgmr.msra.gmra.mxu1 %vm178_vm1, %v150_v18 }
  0x5d   : > { %637 = vmatmul.msk.f32.vlgmr.msra.gmra.mxu2 %vm178_vm1, %v154_v19  ;;  %641 = vmatmul.msk.f32.vlgmr.msra.gmra.mxu3 %vm178_vm1, %v158_v20 }
  0x64   : > { %630 = vmatmul.msk.f32.gmra.mxu0 %vm178_vm1, %v147_v21  ;;  %634 = vmatmul.msk.f32.gmra.mxu1 %vm178_vm1, %v151_v22 }
  0x65   : > { %638 = vmatmul.msk.f32.gmra.mxu2 %vm178_vm1, %v155_v23  ;;  %642 = vmatmul.msk.f32.gmra.mxu3 %vm178_vm1, %v159_v24 }
  0x6c   : > { %631 = vmatmul.msk.f32.gmra.mxu0 %vm178_vm1, %v148_v25  ;;  %635 = vmatmul.msk.f32.gmra.mxu1 %vm178_vm1, %v152_v26 }
  0x6d   : > { %639 = vmatmul.msk.f32.gmra.mxu2 %vm178_vm1, %v156_v27  ;;  %643 = vmatmul.msk.f32.gmra.mxu3 %vm178_vm1, %v160_v28 }
  0x74   : > { %632 = vmatmul.msk.f32.gmra.mxu0 %vm178_vm1, %v149_v29  ;;  %636 = vmatmul.msk.f32.gmra.mxu1 %vm178_vm1, %v153_v30 }
  0x75   : > { %640 = vmatmul.msk.f32.gmra.mxu2 %vm178_vm1, %v157_v31  ;;  %644 = vmatmul.msk.f32.gmra.mxu3 %vm178_vm1, %v161_v32 }
  0xd9   : > { %v292_v35 = vpop.f32.mrf.mxu0  ;;  %v304_v36 = vpop.f32.mrf.mxu1 }
  0xda   : > { %v347_v37 = vsel %vm342_vm2, %v304_v36, -inf  ;;  %v343_v38 = vsel %vm342_vm2, %v292_v35, -inf }
  0xdb   : > { %367 = vmax.xlane.f32.xlu2 %v347_v37  ;;  %359 = vmax.xlane.f32.xlu0 %v343_v38 }
  0xe0   : > { %v316_v39 = vpop.f32.mrf.mxu2  ;;  %v328_v40 = vpop.f32.mrf.mxu3 }
  0xe1   : > { %v295_v41 = vpop.f32.mrf.mxu0  ;;  %v351_v42 = vsel %vm342_vm2, %v316_v39, -inf  ;;  %v355_v43 = vsel %vm342_vm2, %v328_v40, -inf  ;;  %v307_v44 = vpop.f32.mrf.mxu1 }
  0xe2   : > { %v348_v46 = vsel %vm342_vm2, %v307_v44, -inf  ;;  %v344_v49 = vsel %vm342_vm2, %v295_v41, -inf }
  0xe3   : > { %375 = vmax.xlane.f32.xlu2 %v351_v42  ;;  %383 = vmax.xlane.f32.xlu0 %v355_v43 }
  0xe8   : > { %v319_v45 = vpop.f32.mrf.mxu2  ;;  %v331_v48 = vpop.f32.mrf.mxu3 }
  0xe9   : > { %v298_v47 = vpop.f32.mrf.mxu0  ;;  %v352_v53 = vsel %vm342_vm2, %v319_v45, -inf  ;;  %v310_v55 = vpop.f32.mrf.mxu1  ;;  %v1147_v2 = vsel %vm342_vm2, %v331_v48, -inf }
  0xea   : > { %v345_v50 = vsel %vm342_vm2, %v298_v47, -inf  ;;  %v1123_v58 = vsel %vm342_vm2, %v310_v55, -inf }
  0xeb   : > { %369 = vmax.xlane.f32.xlu2 %v348_v46  ;;  %361 = vmax.xlane.f32.xlu0 %v344_v49 }
  0xec   : > { %363 = vmax.xlane.f32.xlu1 %v345_v50 }
  0xf0   : > { %v322_v51 = vpop.f32.mrf.mxu2  ;;  %v334_v54 = vpop.f32.mrf.mxu3 }
  0xf1   : > { %v353_v52 = vsel %vm342_vm2, %v322_v51, -inf  ;;  %v301_v56 = vpop.f32.mrf.mxu0  ;;  %v313_v62 = vpop.f32.mrf.mxu1  ;;  %v1135_v63 = vsel %vm342_vm2, %v334_v54, -inf }
  0xf2   : > { %v1129_v60 = vsel %vm342_vm2, %v301_v56, -inf  ;;  %v1141_v1 = vsel %vm342_vm2, %v313_v62, -inf }
  0xf3   : > { %377 = vmax.xlane.f32.xlu0 %v352_v53 }
  0xf4   : > { %379 = vmax.xlane.f32.xlu1 %v353_v52 }
  0xf8   : > { %v325_v57 = vpop.f32.mrf.mxu2  ;;  %v337_v61 = vpop.f32.mrf.mxu3 }
  0xf9   : > { %v1126_v59 = vsel %vm342_vm2, %v325_v57, -inf  ;;  %v1138_v0 = vsel %vm342_vm2, %v337_v61, -inf }
  0xfa   : > { %381 = vmax.xlane.f32.xlu2 %v1126_v59 }
  0xfb   : > { %371 = vmax.xlane.f32.xlu0 %v1123_v58 }
  0xfc   : > { %365 = vmax.xlane.f32.xlu1 %v1129_v60 }
 0x102   : > { %387 = vmax.xlane.f32.xlu2 %v1135_v63 }
 0x103   : > { %389 = vmax.xlane.f32.xlu0 %v1138_v0 }
 0x104   : > { %373 = vmax.xlane.f32.xlu1 %v1141_v1 }
 0x10c   : > { %385 = vmax.xlane.f32.xlu1 %v1147_v2 }
 0x14e   : > { %v368_v3 = vpop.xlane.xlu2 %367  ;;  %v360_v4 = vpop.xlane.xlu0 %359 }
 0x14f   : > { %v1150_v5 = vsub.f32 %v347_v37, %v368_v3  ;;  %v1152_v6 = vsub.f32 %v343_v38, %v360_v4 }
 0x151   : > { %v415_v7 = vmul.f32 1.442695, %v1150_v5  ;;  %v407_v8 = vmul.f32 1.442695, %v1152_v6 }
 0x153   : > { %749 = vpow2.f32 %v415_v7 }
 0x154   : > { %751 = vpow2.f32 %v407_v8 }
 0x156   : > { %v376_v9 = vpop.xlane.xlu2 %375  ;;  %v384_v10 = vpop.xlane.xlu0 %383 }
 0x157   : > { %v1156_v11 = vsub.f32 %v351_v42, %v376_v9  ;;  %v1158_v12 = vsub.f32 %v355_v43, %v384_v10 }
 0x159   : > { %v750_v13 = vpop.eup %749  ;;  %v423_v14 = vmul.f32 1.442695, %v1156_v11  ;;  %v431_v15 = vmul.f32 1.442695, %v1158_v12 }
 0x15a   : > { %v752_v16 = vpop.eup %751  ;;  %447 = vadd.xlane.f32.xlu2 %v750_v13 }
 0x15b   : > { %753 = vpow2.f32 %v423_v14  ;;  %439 = vadd.xlane.f32.xlu1 %v752_v16 }
 0x15c   : > { %755 = vpow2.f32 %v431_v15 }
 0x15e   : > { %v370_v17 = vpop.xlane.xlu2 %369  ;;  %v362_v18 = vpop.xlane.xlu0 %361 }
 0x15f   : > { %v1162_v19 = vsub.f32 %v348_v46, %v370_v17  ;;  %v1164_v20 = vsub.f32 %v344_v49, %v362_v18  ;;  %v364_v21 = vpop.xlane.xlu1 %363 }
 0x160   : > { %v1168_v26 = vsub.f32 %v345_v50, %v364_v21 }
 0x161   : > { %v754_v22 = vpop.eup %753  ;;  %v417_v23 = vmul.f32 1.442695, %v1162_v19  ;;  %v409_v24 = vmul.f32 1.442695, %v1164_v20 }
 0x162   : > { %v756_v25 = vpop.eup %755  ;;  %455 = vadd.xlane.f32.xlu0 %v754_v22  ;;  %v411_v27 = vmul.f32 1.442695, %v1168_v26 }
 0x163   : > { %757 = vpow2.f32 %v417_v23  ;;  %463 = vadd.xlane.f32.xlu1 %v756_v25 }
 0x164   : > { %759 = vpow2.f32 %v409_v24 }
 0x165   : > { %761 = vpow2.f32 %v411_v27 }
 0x166   : > { %v378_v28 = vpop.xlane.xlu0 %377 }
 0x167   : > { %v1171_v29 = vsub.f32 %v352_v53, %v378_v28  ;;  %v380_v30 = vpop.xlane.xlu1 %379 }
 0x168   : > { %v1173_v31 = vsub.f32 %v353_v52, %v380_v30 }
 0x169   : > { %v758_v32 = vpop.eup %757  ;;  %v425_v33 = vmul.f32 1.442695, %v1171_v29 }
 0x16a   : > { %v760_v34 = vpop.eup %759  ;;  %v427_v35 = vmul.f32 1.442695, %v1173_v31  ;;  %449 = vadd.xlane.f32.xlu0 %v758_v32 }
 0x16b   : > { %763 = vpow2.f32 %v425_v33  ;;  %441 = vadd.xlane.f32.xlu2 %v760_v34  ;;  %v762_v41 = vpop.eup %761 }
 0x16c   : > { %765 = vpow2.f32 %v427_v35 }
 0x16d   : > { %v382_v36 = vpop.xlane.xlu2 %381 }
 0x16e   : > { %v1178_v37 = vsub.f32 %v1126_v59, %v382_v36  ;;  %v372_v38 = vpop.xlane.xlu0 %371 }
 0x16f   : > { %v1181_v39 = vsub.f32 %v1123_v58, %v372_v38  ;;  %v366_v40 = vpop.xlane.xlu1 %365 }
 0x170   : > { %v429_v42 = vmul.f32 1.442695, %v1178_v37  ;;  %v1186_v46 = vsub.f32 %v1129_v60, %v366_v40 }
 0x171   : > { %v764_v43 = vpop.eup %763  ;;  %v419_v44 = vmul.f32 1.442695, %v1181_v39 }
 0x172   : > { %v766_v45 = vpop.eup %765  ;;  %767 = vpow2.f32 %v429_v42  ;;  %443 = vadd.xlane.f32.xlu0 %v762_v41  ;;  %457 = vadd.xlane.f32.xlu1 %v764_v43  ;;  %v413_v48 = vmul.f32 1.442695, %v1186_v46 }
 0x173   : > { %769 = vpow2.f32 %v419_v44  ;;  %459 = vadd.xlane.f32.xlu2 %v766_v45 }
 0x174   : > { %771 = vpow2.f32 %v413_v48 }
 0x175   : > { %v388_v47 = vpop.xlane.xlu2 %387 }
 0x176   : > { %v1190_v49 = vsub.f32 %v1135_v63, %v388_v47  ;;  %v390_v53 = vpop.xlane.xlu0 %389 }
 0x177   : > { %v374_v50 = vpop.xlane.xlu1 %373  ;;  %v1198_v57 = vsub.f32 %v1138_v0, %v390_v53 }
 0x178   : > { %v768_v51 = vpop.eup %767  ;;  %v435_v52 = vmul.f32 1.442695, %v1190_v49  ;;  %v1194_v54 = vsub.f32 %v1141_v1, %v374_v50 }
 0x179   : > { %v770_v55 = vpop.eup %769  ;;  %v437_v58 = vmul.f32 1.442695, %v1198_v57 }
 0x17a   : > { %v421_v56 = vmul.f32 1.442695, %v1194_v54  ;;  %461 = vadd.xlane.f32.xlu0 %v768_v51  ;;  %451 = vadd.xlane.f32.xlu1 %v770_v55  ;;  %773 = vpow2.f32 %v435_v52  ;;  %v772_v60 = vpop.eup %771 }
 0x17c   : > { %775 = vpow2.f32 %v421_v56 }
 0x17d   : > { %777 = vpow2.f32 %v437_v58 }
 0x17f   : > { %v386_v59 = vpop.xlane.xlu1 %385 }
 0x180   : > { %v1202_v61 = vsub.f32 %v1147_v2, %v386_v59  ;;  %v774_v62 = vpop.eup %773 }
 0x182   : > { %v776_v63 = vpop.eup %775  ;;  %v433_v1 = vmul.f32 1.442695, %v1202_v61  ;;  %467 = vadd.xlane.f32.xlu0 %v774_v62  ;;  %445 = vadd.xlane.f32.xlu1 %v772_v60 }
 0x183   : > { %453 = vadd.xlane.f32.xlu2 %v776_v63  ;;  %v778_v3 = vpop.eup %777 }
 0x184   : > { %779 = vpow2.f32 %v433_v1 }
 0x18a   : > { %v780_v0 = vpop.eup %779  ;;  %469 = vadd.xlane.f32.xlu1 %v778_v3 }
 0x18b   : > { %465 = vadd.xlane.f32.xlu2 %v780_v0 }
 0x1cd   : > { %v448_v4 = vpop.xlane.xlu2 %447 }
 0x1ce   : > { %781 = vlog2.f32 %v448_v4  ;;  %v440_v7 = vpop.xlane.xlu1 %439 }
 0x1cf   : > { %783 = vlog2.f32 %v440_v7 }
 0x1d4   : > { %v782_v2 = vpop.eup %781 }
 0x1d5   : > { %v784_v8 = vpop.eup %783  ;;  %v480_v9 = vmul.f32 0.6931472, %v782_v2  ;;  %v456_v10 = vpop.xlane.xlu0 %455 }
 0x1d6   : > { %v472_v13 = vmul.f32 0.6931472, %v784_v8  ;;  %785 = vlog2.f32 %v456_v10  ;;  %v464_v14 = vpop.xlane.xlu1 %463 }
 0x1d7   : > { %v507_v15 = vsub.f32 %v1150_v5, %v480_v9  ;;  %787 = vlog2.f32 %v464_v14 }
 0x1d8   : > { %v503_v16 = vsub.f32 %v1152_v6, %v472_v13 }
 0x1d9   : > { %523 = vst [vmem:[%s975_s29 + $0x20] sm:$0xff] %v507_v15 }
 0x1da   : > { %519 = vst [vmem:[%s975_s29] sm:$0xff] %v503_v16 }
 0x1dc   : > { %v786_v17 = vpop.eup %785 }
 0x1dd   : > { %v788_v18 = vpop.eup %787  ;;  %v488_v21 = vmul.f32 0.6931472, %v786_v17  ;;  %v450_v22 = vpop.xlane.xlu0 %449 }
 0x1de   : > { %v496_v23 = vmul.f32 0.6931472, %v788_v18  ;;  %v442_v24 = vpop.xlane.xlu2 %441  ;;  %789 = vlog2.f32 %v450_v22 }
 0x1df   : > { %v511_v25 = vsub.f32 %v1156_v11, %v488_v21  ;;  %791 = vlog2.f32 %v442_v24 }
 0x1e0   : > { %v515_v27 = vsub.f32 %v1158_v12, %v496_v23 }
 0x1e1   : > { %527 = vst [vmem:[%s975_s29 + $0x40] sm:$0xff] %v511_v25 }
 0x1e2   : > { %531 = vst [vmem:[%s975_s29 + $0x60] sm:$0xff] %v515_v27 }
 0x1e4   : > { %v790_v5 = vpop.eup %789 }
 0x1e5   : > { %v792_v6 = vpop.eup %791  ;;  %v482_v28 = vmul.f32 0.6931472, %v790_v5  ;;  %v444_v30 = vpop.xlane.xlu0 %443 }
 0x1e6   : > { %v458_v32 = vpop.xlane.xlu1 %457  ;;  %v474_v33 = vmul.f32 0.6931472, %v792_v6  ;;  %793 = vlog2.f32 %v444_v30  ;;  %v460_v34 = vpop.xlane.xlu2 %459 }
 0x1e7   : > { %v508_v35 = vsub.f32 %v1162_v19, %v482_v28  ;;  %795 = vlog2.f32 %v460_v34 }
 0x1e8   : > { %v504_v11 = vsub.f32 %v1164_v20, %v474_v33  ;;  %797 = vlog2.f32 %v458_v32 }
 0x1e9   : > { %524 = vst [vmem:[%s975_s29 + $0x28] sm:$0xff] %v508_v35 }
 0x1ea   : > { %520 = vst [vmem:[%s975_s29 + $0x8] sm:$0xff] %v504_v11 }
 0x1ec   : > { %v794_v12 = vpop.eup %793 }
 0x1ed   : > { %v796_v36 = vpop.eup %795  ;;  %v476_v38 = vmul.f32 0.6931472, %v794_v12  ;;  %v462_v40 = vpop.xlane.xlu0 %461 }
 0x1ee   : > { %v452_v41 = vpop.xlane.xlu1 %451  ;;  %v798_v42 = vpop.eup %797  ;;  %v492_v43 = vmul.f32 0.6931472, %v796_v36  ;;  %799 = vlog2.f32 %v462_v40 }
 0x1ef   : > { %v505_v44 = vsub.f32 %v1168_v26, %v476_v38  ;;  %v490_v19 = vmul.f32 0.6931472, %v798_v42  ;;  %801 = vlog2.f32 %v452_v41 }
 0x1f0   : > { %v513_v20 = vsub.f32 %v1173_v31, %v492_v43 }
 0x1f1   : > { %521 = vst [vmem:[%s975_s29 + $0x10] sm:$0xff] %v505_v44  ;;  %v512_v45 = vsub.f32 %v1171_v29, %v490_v19 }
 0x1f2   : > { %529 = vst [vmem:[%s975_s29 + $0x50] sm:$0xff] %v513_v20 }
 0x1f3   : > { %528 = vst [vmem:[%s975_s29 + $0x48] sm:$0xff] %v512_v45 }
 0x1f4   : > { %v800_v47 = vpop.eup %799 }
 0x1f5   : > { %v802_v48 = vpop.eup %801  ;;  %v494_v50 = vmul.f32 0.6931472, %v800_v47  ;;  %v468_v51 = vpop.xlane.xlu0 %467 }
 0x1f6   : > { %v446_v52 = vpop.xlane.xlu1 %445  ;;  %v484_v53 = vmul.f32 0.6931472, %v802_v48  ;;  %803 = vlog2.f32 %v468_v51  ;;  %v454_v55 = vpop.xlane.xlu2 %453 }
 0x1f7   : > { %v514_v26 = vsub.f32 %v1178_v37, %v494_v50  ;;  %805 = vlog2.f32 %v454_v55 }
 0x1f8   : > { %v509_v31 = vsub.f32 %v1181_v39, %v484_v53  ;;  %807 = vlog2.f32 %v446_v52 }
 0x1f9   : > { %530 = vst [vmem:[%s975_s29 + $0x58] sm:$0xff] %v514_v26 }
 0x1fa   : > { %525 = vst [vmem:[%s975_s29 + $0x30] sm:$0xff] %v509_v31 }
 0x1fc   : > { %v804_v29 = vpop.eup %803 }
 0x1fd   : > { %v806_v56 = vpop.eup %805  ;;  %v500_v58 = vmul.f32 0.6931472, %v804_v29 }
 0x1fe   : > { %v470_v59 = vpop.xlane.xlu1 %469  ;;  %v808_v60 = vpop.eup %807  ;;  %v486_v62 = vmul.f32 0.6931472, %v806_v56 }
 0x1ff   : > { %v466_v63 = vpop.xlane.xlu2 %465  ;;  %809 = vlog2.f32 %v470_v59  ;;  %v517_v37 = vsub.f32 %v1190_v49, %v500_v58  ;;  %v478_v1 = vmul.f32 0.6931472, %v808_v60 }
 0x200   : > { %811 = vlog2.f32 %v466_v63  ;;  %v510_v39 = vsub.f32 %v1194_v54, %v486_v62 }
 0x201   : > { %533 = vst [vmem:[%s975_s29 + $0x70] sm:$0xff] %v517_v37  ;;  %v506_v3 = vsub.f32 %v1186_v46, %v478_v1 }
 0x202   : > { %526 = vst [vmem:[%s975_s29 + $0x38] sm:$0xff] %v510_v39 }
 0x203   : > { %522 = vst [vmem:[%s975_s29 + $0x18] sm:$0xff] %v506_v3 }
 0x205   : > { %v810_v0 = vpop.eup %809 }
 0x206   : > { %v812_v49 = vpop.eup %811  ;;  %v502_v54 = vmul.f32 0.6931472, %v810_v0 }
 0x207   : > { %v498_v4 = vmul.f32 0.6931472, %v812_v49 }
 0x208   : > { %v518_v7 = vsub.f32 %v1198_v57, %v502_v54 }
 0x209   : > { %v516_v46 = vsub.f32 %v1202_v61, %v498_v4 }
 0x20a   : > { %534 = vst [vmem:[%s975_s29 + $0x78] sm:$0xff] %v518_v7 }
 0x20b   : > { %532 = vst [vmem:[%s975_s29 + $0x68] sm:$0xff] %v516_v46 }
 0x20c   : > { %852 = shalt.err (!%p849_p3)
}
 0x20d   : > { %s900_s27 = smov 128   ;;  %s901_s29 = smov 8  }
 0x20e   : > { %699 = dma.vmem_to_hbm [thread:$0]  (%p962_p5), %s549_s12, 2048, %s551_s13, %s536_s4, %s900_s27, %s900_s27, %s901_s29  }
 0x20f PF: > { %p705_p4 = scmp.ge.s32.totalorder %s893_s19, 2  ;;  %s565_s30 = sand.u32 1, %s881_s16  }
 0x210   : > { %s566_s5 = scalar_lea.sflag [#allocation6], %s565_s30 }
 0x211   : > { %p702_p7 = pnand %p705_p4, %p966_p6 }
 0x213   : > { %p703_p8 = pneg %p702_p7 }
 0x215   : > { %876 = dma.done.wait (%p703_p8), %s566_s5, 2048  }
 0x216   : > { %878 = vsyncadd (%p703_p8), %s566_s5, 4294965248  ;;  %p21_p9 = scmp.ge.s32.totalorder %s948_s21, 4   ;;  %s1280_s16 = smov %s885_s17 }
 0x217   : > { %s1281_s17 = smov %s889_s18  ;;  %s1282_s18 = smov %s960_s24 }
 0x218   : > { %s1283_s19 = smov %s948_s21  ;;  %23 = sbr.rel (!%p21_p9) target bundleno = 9 (0x9), region = 80 }
 0x21d   :  { %572 = vsyncpa [#allocation6], 1 }
 0x21e   :  { %574 = vsyncpa [#allocation6 + $0x1], 1 }

</bundles_post_ra>
